<compile_context>
chip_gen: v7x
topology: tpu7x:2x2x1
jax: 0.10.0
libtpu: 0.0.40
codegen_flags: <defaults>
</compile_context>

<pallas_src>
import jax
import jax.numpy as jnp
from jax.experimental import pallas as pl
from jax.experimental.pallas import tpu as pltpu

# ---------------- small synthetic shapes ----------------
B = 2             # batch
C_IN = 3          # image channels
H = W = 56        # image spatial size
P = 8             # stand-in backbone conv: kernel = stride = P
HF, WF = H // P, W // P   # 7 x 7 feature map -> AvgPool2d(kernel_size=7) == mean over positions
S = HF * WF               # 49 patches per image
S_PAD = 56                # per-image rows padded to a multiple of 8 (sublane aligned)
K = P * P * C_IN          # 192
K_PAD = 256               # K padded to a multiple of 128 (lane aligned / full MXU depth)
C_FEAT = 128              # backbone output channels (real resnet: 2048; small synthetic here)
N_LABELS = 16             # args.num_labels
L_PAD = 128               # lane-dense classifier output width (sliced to N_LABELS in wrapper)
M_PAD = B * S_PAD         # 112 rows in the single fused backbone matmul


def _visual_extractor_kernel(patches_ref, w_bb_ref, w_cls_ref, b_cls_ref,
                             patch_feats_ref, avg_feats_ref, labels_ref):
    # --- backbone stand-in conv (kernel=P, stride=P): one flat bf16 MXU matmul, f32 acc ---
    x = patches_ref[...]                                          # [M_PAD, K_PAD] bf16
    w_bb = w_bb_ref[...]                                          # [K_PAD, C]     bf16
    pf = jnp.dot(x, w_bb, preferred_element_type=jnp.float32)     # [M_PAD, C]     f32
    # patch_feats.reshape(B, C, -1).permute(0, 2, 1) in PyTorch == this per-image [S, C] layout
    patch_feats_ref[...] = pf

    # --- AvgPool2d(kernel_size=7).squeeze().reshape(-1, C): mean over the S valid positions ---
    # Padded rows of x are exact zeros -> their pf rows are zero; sum over S_PAD and divide by S.
    # This is an XLU reduction of the f32 features (no extra MXU pass, survives adding BN/ReLU).
    pf3 = pf.reshape(B, S_PAD, C_FEAT)
    avg = jnp.sum(pf3, axis=1) * (1.0 / S)                        # [B, C] f32
    avg_feats_ref[...] = avg

    # --- classifier: nn.Linear(C_FEAT, N_LABELS), one batched f32 matmul, lane-dense output ---
    labels_ref[...] = (jnp.dot(avg, w_cls_ref[...],
                               preferred_element_type=jnp.float32)
                       + b_cls_ref[...])                          # [B, L_PAD] f32


@jax.jit
def visual_extractor_forward(images, w_bb, w_cls, b_cls):
    """images: NCHW [B, C_IN, H, W] float32 (PyTorch convention)."""
    # glue: NCHW -> NHWC -> non-overlapping PxP patches -> [B, S, K]
    x = jnp.transpose(images, (0, 2, 3, 1))                       # NHWC
    x = x.reshape(B, HF, P, WF, P, C_IN)
    x = jnp.transpose(x, (0, 1, 3, 2, 4, 5)).reshape(B, S, K)     # [B, S, K]

    # zero-pad rows (S -> S_PAD, per image) and K (K -> K_PAD), fold batch into M, cast to bf16
    patches = jnp.zeros((B, S_PAD, K_PAD), jnp.float32)
    patches = patches.at[:, :S, :K].set(x).reshape(M_PAD, K_PAD).astype(jnp.bfloat16)

    # zero-pad backbone weight along K (padded rows multiply padded zero columns -> exact)
    w_bb_pad = jnp.zeros((K_PAD, C_FEAT), jnp.float32).at[:K, :].set(w_bb).astype(jnp.bfloat16)

    # pad classifier params to a lane-dense 128-wide output (extra lanes are exact zeros)
    w_cls_pad = jnp.zeros((C_FEAT, L_PAD), jnp.float32).at[:, :N_LABELS].set(w_cls)
    b_cls_pad = jnp.zeros((1, L_PAD), jnp.float32).at[:, :N_LABELS].set(
        b_cls.reshape(1, N_LABELS))

    out_shape = (
        jax.ShapeDtypeStruct((M_PAD, C_FEAT), jnp.float32),       # patch_feats (padded rows)
        jax.ShapeDtypeStruct((B, C_FEAT), jnp.float32),           # avg_feats
        jax.ShapeDtypeStruct((B, L_PAD), jnp.float32),            # labels (padded lanes)
    )

    flops = 2 * M_PAD * K_PAD * C_FEAT + 2 * B * C_FEAT * L_PAD
    bytes_accessed = (M_PAD * K_PAD * 2 + K_PAD * C_FEAT * 2 + C_FEAT * L_PAD * 4 + L_PAD * 4
                      + M_PAD * C_FEAT * 4 + B * C_FEAT * 4 + B * L_PAD * 4)

    pf_pad, avg_feats, lab_pad = pl.pallas_call(
        _visual_extractor_kernel,
        out_shape=out_shape,
        cost_estimate=pl.CostEstimate(
            flops=flops, transcendentals=0, bytes_accessed=bytes_accessed),
    )(patches, w_bb_pad, w_cls_pad, b_cls_pad)

    patch_feats = pf_pad.reshape(B, S_PAD, C_FEAT)[:, :S, :]      # [B, S, C]
    labels = lab_pad[:, :N_LABELS]                                # [B, N_LABELS]
    return patch_feats, avg_feats, labels


def _reference(images, w_bb, w_cls, b_cls):
    x = jnp.transpose(images, (0, 2, 3, 1))
    x = x.reshape(B, HF, P, WF, P, C_IN)
    x = jnp.transpose(x, (0, 1, 3, 2, 4, 5)).reshape(B, S, K)
    pf = jnp.einsum('bsk,kc->bsc', x, w_bb)
    avg = jnp.mean(pf, axis=1)
    labels = avg @ w_cls + b_cls
    return pf, avg, labels


if __name__ == "__main__":
    key = jax.random.PRNGKey(0)
    k_img, k_bb, k_cls, k_b = jax.random.split(key, 4)

    # deterministic synthetic inputs / parameters
    images = jax.random.normal(k_img, (B, C_IN, H, W), dtype=jnp.float32)        # NCHW
    w_bb = jax.random.normal(k_bb, (K, C_FEAT), dtype=jnp.float32) / jnp.sqrt(K)
    w_cls = jax.random.normal(k_cls, (C_FEAT, N_LABELS), dtype=jnp.float32) / jnp.sqrt(C_FEAT)
    b_cls = jax.random.normal(k_b, (1, N_LABELS), dtype=jnp.float32) * 0.01

    patch_feats, avg_feats, labels = visual_extractor_forward(images, w_bb, w_cls, b_cls)
    jax.block_until_ready((patch_feats, avg_feats, labels))

    # sanity check against plain-JAX f32 reference.
    # NOTE: the kernel uses bf16 matmul inputs with f32 accumulation, so numerics shift by
    # ~1e-2 relative; the 5e-2 tolerance accommodates this precision change.
    pf_ref, avg_ref, lab_ref = _reference(images, w_bb, w_cls, b_cls)
    assert patch_feats.shape == (B, S, C_FEAT)
    assert avg_feats.shape == (B, C_FEAT)
    assert labels.shape == (B, N_LABELS)
    assert jnp.allclose(patch_feats, pf_ref, rtol=5e-2, atol=5e-2)
    assert jnp.allclose(avg_feats, avg_ref, rtol=5e-2, atol=5e-2)
    assert jnp.allclose(labels, lab_ref, rtol=5e-2, atol=5e-2)

    print("KERNEL_OK")
</pallas_src>

<mosaic_0001>
module attributes {stable_mosaic.version = 11 : i64} {
  func.func @_visual_extractor_kernel(%arg0: memref<112x256xbf16, #tpu.memory_space<vmem>>, %arg1: memref<256x128xbf16, #tpu.memory_space<vmem>>, %arg2: memref<128x128xf32, #tpu.memory_space<vmem>>, %arg3: memref<1x128xf32, #tpu.memory_space<vmem>>, %arg4: memref<112x128xf32, #tpu.memory_space<vmem>>, %arg5: memref<2x128xf32, #tpu.memory_space<vmem>>, %arg6: memref<2x128xf32, #tpu.memory_space<vmem>>) attributes {dimension_semantics = [], scalar_prefetch = 0 : i64, scratch_operands = 0 : i64, tpu.core_type = #tpu.core_type<tc>} {
    %c0 = arith.constant 0 : index
    %c0_0 = arith.constant 0 : index
    %0 = vector.load %arg0[%c0, %c0_0] : memref<112x256xbf16, #tpu.memory_space<vmem>>, vector<112x256xbf16>
    %c0_1 = arith.constant 0 : index
    %c0_2 = arith.constant 0 : index
    %1 = vector.load %arg1[%c0_1, %c0_2] : memref<256x128xbf16, #tpu.memory_space<vmem>>, vector<256x128xbf16>
    %cst = arith.constant dense<0.000000e+00> : vector<112x128xf32>
    %2 = tpu.matmul %0, %1, %cst {dimension_numbers = #tpu.dot_dimension_numbers<[1], [0], [0], [1], [0, 0, 1, 1], [], []>} : vector<112x256xbf16>, vector<256x128xbf16>, vector<112x128xf32> -> vector<112x128xf32>
    %c0_3 = arith.constant 0 : index
    %c0_4 = arith.constant 0 : index
    %3 = vector.load %arg4[%c0_3, %c0_4] : memref<112x128xf32, #tpu.memory_space<vmem>>, vector<112x128xf32>
    tpu.vector_store %arg4[%c0_3, %c0_4], %2 {strides = array<i32>} : memref<112x128xf32, #tpu.memory_space<vmem>>, vector<112x128xf32>,
    %4 = vector.shape_cast %2 : vector<112x128xf32> to vector<2x56x128xf32>
    %cst_5 = arith.constant dense<0.000000e+00> : vector<2x128xf32>
    %5 = vector.multi_reduction <add>, %4, %cst_5 [1] : vector<2x56x128xf32> to vector<2x128xf32>
    %cst_6 = arith.constant 0.0204081628 : f32
    %6 = vector.broadcast %cst_6 : f32 to vector<2x128xf32>
    %7 = arith.mulf %5, %6 : vector<2x128xf32>
    %c0_7 = arith.constant 0 : index
    %c0_8 = arith.constant 0 : index
    %8 = vector.load %arg5[%c0_7, %c0_8] : memref<2x128xf32, #tpu.memory_space<vmem>>, vector<2x128xf32>
    tpu.vector_store %arg5[%c0_7, %c0_8], %7 {strides = array<i32>} : memref<2x128xf32, #tpu.memory_space<vmem>>, vector<2x128xf32>,
    %c0_9 = arith.constant 0 : index
    %c0_10 = arith.constant 0 : index
    %9 = vector.load %arg2[%c0_9, %c0_10] : memref<128x128xf32, #tpu.memory_space<vmem>>, vector<128x128xf32>
    %cst_11 = arith.constant dense<0.000000e+00> : vector<2x128xf32>
    %10 = tpu.matmul %7, %9, %cst_11 {dimension_numbers = #tpu.dot_dimension_numbers<[1], [0], [0], [1], [0, 0, 1, 1], [], []>} : vector<2x128xf32>, vector<128x128xf32>, vector<2x128xf32> -> vector<2x128xf32>
    %c0_12 = arith.constant 0 : index
    %c0_13 = arith.constant 0 : index
    %11 = vector.load %arg3[%c0_12, %c0_13] : memref<1x128xf32, #tpu.memory_space<vmem>>, vector<1x128xf32>
    %12 = vector.broadcast %11 : vector<1x128xf32> to vector<2x128xf32>
    %13 = arith.addf %10, %12 : vector<2x128xf32>
    %c0_14 = arith.constant 0 : index
    %c0_15 = arith.constant 0 : index
    %14 = vector.load %arg6[%c0_14, %c0_15] : memref<2x128xf32, #tpu.memory_space<vmem>>, vector<2x128xf32>
    tpu.vector_store %arg6[%c0_14, %c0_15], %13 {strides = array<i32>} : memref<2x128xf32, #tpu.memory_space<vmem>>, vector<2x128xf32>,
    return
  }
}

</mosaic_0001>

<bundles_post_ra>
// kernel: visual_extractor_forward.1
= control target key start
LH: loop header
LB: loop body
LE: loop exit
PB: predicated region body
PF: predicated region fallthrough
CT: control target
= control target key end

     0   :  { %12 = vsyncpa [#allocation3], 0  ;;  %s1014_s0 = inlined_call_operand.vmem [shape: bf16[112,256], index: 0, kind: input, shape index: {}]   ;;  %s1015_s1 = inlined_call_operand.vmem [shape: bf16[256,128], index: 1, kind: input, shape index: {}]   ;;  %s1016_s2 = inlined_call_operand.vmem [shape: f32[128,128], index: 2, kind: input, shape index: {}]   ;;  %s1017_s3 = inlined_call_operand.vmem [shape: f32[1,128], index: 3, kind: input, shape index: {}]   ;;  %s1018_s4 = inlined_call_operand.vmem [shape: f32[112,128], index: 4, kind: output, shape index: {0}]   ;;  %s1019_s5 = inlined_call_operand.hbm [shape: f32[2,128], index: 5, kind: output, shape index: {1}]   ;;  %s1020_s6 = inlined_call_operand.hbm [shape: f32[2,128], index: 6, kind: output, shape index: {2}]  }
   0x1   :  { %v682_v0 = vld [vmem:[%s1015_s1 + $0x40] sm:$0xff]   ;;  %v684_v2 = vld [vmem:[%s1015_s1 + $0x48] sm:$0xff]   ;;  %v686_v4 = vld [vmem:[%s1015_s1 + $0x50] sm:$0xff]  }
   0x2   :  { %v683_v1 = vld [vmem:[%s1015_s1] sm:$0xff]   ;;  %527 = vmatprep.subr.bf16.mxu0 %v682_v0  ;;  %661 = vmatprep.subr.bf16.mxu1 %v682_v0  ;;  %v685_v3 = vld [vmem:[%s1015_s1 + $0x8] sm:$0xff]   ;;  %v687_v5 = vld [vmem:[%s1015_s1 + $0x10] sm:$0xff]  }
   0x3   :  { %528 = vmatpush3.bf16.msra.mxu0 %v683_v1  ;;  %669 = vmatpush3.bf16.msra.mxu1 %v683_v1  ;;  %v688_v6 = vld [vmem:[%s1015_s1 + $0x58] sm:$0xff]   ;;  %v690_v8 = vld [vmem:[%s1015_s1 + $0x60] sm:$0xff]   ;;  %v692_v10 = vld [vmem:[%s1015_s1 + $0x68] sm:$0xff]  }
   0x4   :  { %529 = vmatprep.subr.bf16.mxu0 %v684_v2  ;;  %662 = vmatprep.subr.bf16.mxu1 %v684_v2  ;;  %v689_v7 = vld [vmem:[%s1015_s1 + $0x18] sm:$0xff]   ;;  %v691_v9 = vld [vmem:[%s1015_s1 + $0x20] sm:$0xff]   ;;  %v693_v13 = vld [vmem:[%s1015_s1 + $0x28] sm:$0xff]  }
   0x5   :  { %v700_v11 = vld [vmem:[%s1014_s0 + $0x4] ss:$8 sps:$4 sm:$0xff]   ;;  %v703_v12 = vld [vmem:[%s1014_s0 + $0x34] ss:$8 sps:$4 sm:$0xff]  }
   0x6   :  { %v694_v14 = vld [vmem:[%s1015_s1 + $0x70] sm:$0xff]   ;;  %267 = vmatprep.mubr.bf16.mxu0 %v700_v11  ;;  %291 = vmatprep.mubr.bf16.mxu1 %v703_v12  ;;  %v696_v16 = vld [vmem:[%s1015_s1 + $0x78] sm:$0xff]  }
   0x7   :  { %530 = vmatpush3.bf16.msra.mxu0 %v685_v3  ;;  %670 = vmatpush3.bf16.msra.mxu1 %v685_v3  ;;  %v695_v15 = vld [vmem:[%s1015_s1 + $0x30] sm:$0xff]  }
   0x8   :  { %531 = vmatprep.subr.bf16.mxu0 %v686_v4  ;;  %663 = vmatprep.subr.bf16.mxu1 %v686_v4 }
   0xb   :  { %532 = vmatpush3.bf16.msra.mxu0 %v687_v5  ;;  %671 = vmatpush3.bf16.msra.mxu1 %v687_v5 }
   0xc   :  { %533 = vmatprep.subr.bf16.mxu0 %v688_v6  ;;  %664 = vmatprep.subr.bf16.mxu1 %v688_v6 }
   0xf   :  { %534 = vmatpush3.bf16.msra.mxu0 %v689_v7  ;;  %672 = vmatpush3.bf16.msra.mxu1 %v689_v7 }
  0x10   :  { %535 = vmatprep.subr.bf16.mxu0 %v690_v8  ;;  %665 = vmatprep.subr.bf16.mxu1 %v690_v8 }
  0x13   :  { %536 = vmatpush3.bf16.msra.mxu0 %v691_v9  ;;  %673 = vmatpush3.bf16.msra.mxu1 %v691_v9 }
  0x14   :  { %537 = vmatprep.subr.bf16.mxu0 %v692_v10  ;;  %666 = vmatprep.subr.bf16.mxu1 %v692_v10 }
  0x17   :  { %538 = vmatpush3.bf16.msra.mxu0 %v693_v13  ;;  %674 = vmatpush3.bf16.msra.mxu1 %v693_v13 }
  0x18   :  { %539 = vmatprep.subr.bf16.mxu0 %v694_v14  ;;  %667 = vmatprep.subr.bf16.mxu1 %v694_v14 }
  0x19   :  { %13 = vsyncpa [#allocation5], 0  ;;  %v697_v17 = vld [vmem:[%s1015_s1 + $0x38] sm:$0xff]   ;;  %v698_v18 = vld [vmem:[%s1014_s0] ss:$8 sps:$4 sm:$0xff]   ;;  %v767_v33 = vmov 0.0|0.0  }
  0x1a   :  { %v701_v19 = vld [vmem:[%s1014_s0 + $0x30] ss:$8 sps:$4 sm:$0xff]   ;;  %v704_v20 = vld [vmem:[%s1014_s0 + $0x14] ss:$8 sps:$4 sm:$0xff]   ;;  %v706_v21 = vld [vmem:[%s1014_s0 + $0x44] ss:$8 sps:$4 sm:$0xff]  }
  0x1b   :  { %540 = vmatpush3.bf16.msra.mxu0 %v695_v15  ;;  %675 = vmatpush3.bf16.msra.mxu1 %v695_v15  ;;  %v708_v22 = vld [vmem:[%s1014_s0 + $0x10] ss:$8 sps:$4 sm:$0xff]   ;;  %v709_v23 = vld [vmem:[%s1014_s0 + $0x40] ss:$8 sps:$4 sm:$0xff]   ;;  %v710_v24 = vld [vmem:[%s1014_s0 + $0x24] ss:$8 sps:$4 sm:$0xff]  }
  0x1c   :  { %541 = vmatprep.subr.bf16.mxu0 %v696_v16  ;;  %668 = vmatprep.subr.bf16.mxu1 %v696_v16  ;;  %v712_v25 = vld [vmem:[%s1014_s0 + $0x54] ss:$8 sps:$4 sm:$0xff]   ;;  %v714_v26 = vld [vmem:[%s1014_s0 + $0x20] ss:$8 sps:$4 sm:$0xff]   ;;  %v715_v27 = vld [vmem:[%s1014_s0 + $0x50] ss:$8 sps:$4 sm:$0xff]  }
  0x1d   :  { %v716_v28 = vld [vmem:[%s1014_s0 + $0x64] ss:$8 sps:$4 sm:$0xff]   ;;  %v718_v29 = vld [vmem:[%s1014_s0 + $0x60] ss:$8 sps:$4 sm:$0xff]   ;;  %v372_v34 = vld [vmem:[%s1016_s2 + $0x10] sm:$0xff]  ;;  %vm768_vm0 = vmmov 0  }
  0x1e   :  { %v370_v30 = vld [vmem:[%s1016_s2] sm:$0xff]  ;;  %v371_v31 = vld [vmem:[%s1016_s2 + $0x8] sm:$0xff]  ;;  %v373_v35 = vld [vmem:[%s1016_s2 + $0x18] sm:$0xff]  ;;  %v769_v55 = vmov 0.0   ;;  %vm366_vm1 = vcmask 1041409   ;;  %s770_s0 = smov [#allocation2]  }
  0x1f   :  { %542 = vmatpush3.bf16.msra.mxu0 %v697_v17  ;;  %676 = vmatpush3.bf16.msra.mxu1 %v697_v17  ;;  %v638_v32 = vpack.c.bf16 %v371_v31, %v370_v30  ;;  %v641_v36 = vpack.c.bf16 %v373_v35, %v372_v34  ;;  %v374_v37 = vld [vmem:[%s1016_s2 + $0x20] sm:$0xff]  ;;  %v375_v38 = vld [vmem:[%s1016_s2 + $0x28] sm:$0xff]  ;;  %v376_v40 = vld [vmem:[%s1016_s2 + $0x30] sm:$0xff] }
  0x20   :  { %637 = vmatprep.subr.bf16.mxu1 %v767_v33  ;;  %v644_v39 = vpack.c.bf16 %v375_v38, %v374_v37  ;;  %v377_v41 = vld [vmem:[%s1016_s2 + $0x38] sm:$0xff]  ;;  %v378_v43 = vld [vmem:[%s1016_s2 + $0x40] sm:$0xff]  ;;  %v379_v44 = vld [vmem:[%s1016_s2 + $0x48] sm:$0xff] }
  0x21   :  { %v647_v42 = vpack.c.bf16 %v377_v41, %v376_v40  ;;  %v650_v45 = vpack.c.bf16 %v379_v44, %v378_v43  ;;  %v380_v46 = vld [vmem:[%s1016_s2 + $0x50] sm:$0xff]  ;;  %v381_v47 = vld [vmem:[%s1016_s2 + $0x58] sm:$0xff]  ;;  %v382_v49 = vld [vmem:[%s1016_s2 + $0x60] sm:$0xff] }
  0x22   :  { %268 = vmatmul.mubr.bf16.vlgmr.msra.gmra.mrb[0].mxu0 %v698_v18  ;;  %292 = vmatmul.mubr.bf16.vlgmr.msra.gmra.mrb[0].mxu1 %v701_v19  ;;  %v653_v48 = vpack.c.bf16 %v381_v47, %v380_v46  ;;  %v383_v50 = vld [vmem:[%s1016_s2 + $0x68] sm:$0xff]  ;;  %v384_v52 = vld [vmem:[%s1016_s2 + $0x70] sm:$0xff]  ;;  %v385_v53 = vld [vmem:[%s1016_s2 + $0x78] sm:$0xff]  ;;  %s472_s2 = sshll.u32 %s770_s0, 4  ;;  %s473_s2 = int_to_ptr.vmem [resolvable:$true] %s472_s2 }
  0x23   :  { %275 = vmatprep.mubr.bf16.mxu0 %v704_v20  ;;  %299 = vmatprep.mubr.bf16.mxu1 %v706_v21  ;;  %v656_v51 = vpack.c.bf16 %v383_v50, %v382_v49  ;;  %v659_v54 = vpack.c.bf16 %v385_v53, %v384_v52  ;;  %p724_p1 = scmp.lt.s32.totalorder %s473_s2, %s473_s2 }
  0x24   :  { %639 = vmatpush3.bf16.msra.mxu1 %v638_v32 }
  0x25   :  { %640 = vmatprep.subr.bf16.mxu1 %v767_v33 }
  0x28   :  { %642 = vmatpush3.bf16.msra.mxu1 %v641_v36 }
  0x29   :  { %643 = vmatprep.subr.bf16.mxu1 %v767_v33 }
  0x2a   :  { %276 = vmatmul.mubr.bf16.gmra.mrb[4].mxu0 %v708_v22  ;;  %300 = vmatmul.mubr.bf16.gmra.mrb[4].mxu1 %v709_v23 }
  0x2b   :  { %283 = vmatprep.mubr.bf16.mxu0 %v710_v24  ;;  %307 = vmatprep.mubr.bf16.mxu1 %v712_v25 }
  0x2c   :  { %645 = vmatpush3.bf16.msra.mxu1 %v644_v39 }
  0x2d   :  { %646 = vmatprep.subr.bf16.mxu1 %v767_v33 }
  0x30   :  { %648 = vmatpush3.bf16.msra.mxu1 %v647_v42 }
  0x31   :  { %649 = vmatprep.subr.bf16.mxu1 %v767_v33 }
  0x32   :  { %284 = vmatmul.mubr.bf16.gmra.mrb[8].mxu0 %v714_v26  ;;  %308 = vmatmul.mubr.bf16.gmra.mrb[8].mxu1 %v715_v27 }
  0x33   :  { %315 = vmatprep.mubr.bf16.mxu1 %v716_v28 }
  0x34   :  { %651 = vmatpush3.bf16.msra.mxu1 %v650_v45 }
  0x35   :  { %652 = vmatprep.subr.bf16.mxu1 %v767_v33 }
  0x38   :  { %654 = vmatpush3.bf16.msra.mxu1 %v653_v48 }
  0x39   :  { %655 = vmatprep.subr.bf16.mxu1 %v767_v33 }
  0x3a   :  { %316 = vmatmul.mubr.bf16.gmra.mrb[12].mxu1 %v718_v29 }
  0x3b   :  { %634 = vmatprep.mubr.msk.f32.mxu1 %vm768_vm0, %v769_v55 }
  0x3c   :  { %657 = vmatpush3.bf16.msra.mxu1 %v656_v51 }
  0x3d   :  { %658 = vmatprep.subr.bf16.mxu1 %v767_v33 }
  0x40   :  { %660 = vmatpush3.bf16.msra.mxu1 %v659_v54 }
  0xf5   :  { %v561_v56 = vpop.f32.mrb[0].mxu1  ;;  %v543_v57 = vpop.f32.mrb[0].mxu0 }
  0xf6   :  { %v562_v58 = vpop.f32.mrb[1].mxu1  ;;  %v544_v59 = vpop.f32.mrb[1].mxu0 }
  0xf7   :  { %v563_v60 = vadd.f32 %v562_v58, %v561_v56  ;;  %v564_v61 = vpop.f32.mrb[2].mxu1  ;;  %v545_v62 = vadd.f32 %v544_v59, %v543_v57  ;;  %v546_v63 = vpop.f32.mrb[2].mxu0 }
  0xf8   :  { %v565_v0 = vpop.f32.mrb[3].mxu1  ;;  %v547_v1 = vpop.f32.mrb[3].mxu0 }
  0xf9   :  { %330 = vst [vmem:[%s1018_s4 + $0x30] sm:$0xff] %v563_v60  ;;  %v566_v2 = vadd.f32 %v565_v0, %v564_v61  ;;  %324 = vst [vmem:[%s1018_s4] sm:$0xff] %v545_v62  ;;  %v548_v3 = vadd.f32 %v547_v1, %v546_v63 }
  0xfb   :  { %331 = vst [vmem:[%s1018_s4 + $0x38] sm:$0xff] %v566_v2  ;;  %325 = vst [vmem:[%s1018_s4 + $0x8] sm:$0xff] %v548_v3  ;;  %v338_v4 = vadd.f32 %v548_v3, %v545_v62 }
  0xfd   :  { %v549_v5 = vpop.f32.mrb[4].mxu0  ;;  %v567_v6 = vpop.f32.mrb[4].mxu1 }
  0xfe   :  { %v550_v7 = vpop.f32.mrb[5].mxu0  ;;  %v568_v8 = vpop.f32.mrb[5].mxu1 }
  0xff   :  { %v551_v9 = vadd.f32 %v550_v7, %v549_v5  ;;  %v569_v10 = vadd.f32 %v568_v8, %v567_v6  ;;  %v552_v11 = vpop.f32.mrb[6].mxu0  ;;  %v570_v12 = vpop.f32.mrb[6].mxu1 }
 0x100   :  { %v553_v13 = vpop.f32.mrb[7].mxu0  ;;  %v571_v14 = vpop.f32.mrb[7].mxu1 }
 0x101   :  { %326 = vst [vmem:[%s1018_s4 + $0x10] sm:$0xff] %v551_v9  ;;  %v339_v15 = vadd.f32 %v551_v9, %v338_v4  ;;  %332 = vst [vmem:[%s1018_s4 + $0x40] sm:$0xff] %v569_v10  ;;  %v350_v16 = vadd.f32 %v569_v10, %v566_v2  ;;  %v554_v17 = vadd.f32 %v553_v13, %v552_v11 }
 0x102   :  { %v572_v18 = vadd.f32 %v571_v14, %v570_v12 }
 0x103   :  { %327 = vst [vmem:[%s1018_s4 + $0x18] sm:$0xff] %v554_v17  ;;  %v340_v19 = vadd.f32 %v554_v17, %v339_v15 }
 0x104   :  { %333 = vst [vmem:[%s1018_s4 + $0x48] sm:$0xff] %v572_v18  ;;  %v351_v20 = vadd.f32 %v572_v18, %v350_v16 }
 0x105   :  { %v555_v21 = vpop.f32.mrb[8].mxu0  ;;  %v573_v22 = vpop.f32.mrb[8].mxu1 }
 0x106   :  { %v556_v23 = vpop.f32.mrb[9].mxu0  ;;  %v574_v24 = vpop.f32.mrb[9].mxu1 }
 0x107   :  { %v557_v25 = vadd.f32 %v556_v23, %v555_v21  ;;  %v575_v26 = vadd.f32 %v574_v24, %v573_v22  ;;  %v558_v27 = vpop.f32.mrb[10].mxu0  ;;  %v576_v28 = vpop.f32.mrb[10].mxu1 }
 0x108   :  { %v559_v29 = vpop.f32.mrb[11].mxu0  ;;  %v577_v30 = vpop.f32.mrb[11].mxu1 }
 0x109   :  { %328 = vst [vmem:[%s1018_s4 + $0x20] sm:$0xff] %v557_v25  ;;  %v341_v31 = vadd.f32 %v557_v25, %v340_v19  ;;  %334 = vst [vmem:[%s1018_s4 + $0x50] sm:$0xff] %v575_v26  ;;  %v352_v32 = vadd.f32 %v575_v26, %v351_v20  ;;  %v560_v33 = vadd.f32 %v559_v29, %v558_v27 }
 0x10a   :  { %v578_v34 = vadd.f32 %v577_v30, %v576_v28 }
 0x10b   :  { %329 = vst [vmem:[%s1018_s4 + $0x28] sm:$0xff] %v560_v33  ;;  %v342_v35 = vadd.f32 %v560_v33, %v341_v31 }
 0x10c   :  { %335 = vst [vmem:[%s1018_s4 + $0x58] sm:$0xff] %v578_v34  ;;  %v353_v36 = vadd.f32 %v578_v34, %v352_v32 }
 0x10d   :  { %v343_v37 = vadd.f32 %v563_v60, %v342_v35  ;;  %v579_v38 = vpop.f32.mrb[12].mxu1 }
 0x10e   :  { %v580_v39 = vpop.f32.mrb[13].mxu1 }
 0x10f   :  { %v344_v40 = vrot.slane %v343_v37, 4  ;;  %v581_v41 = vadd.f32 %v580_v39, %v579_v38  ;;  %v582_v42 = vpop.f32.mrb[14].mxu1 }
 0x110   :  { %v583_v43 = vpop.f32.mrb[15].mxu1 }
 0x111   :  { %v345_v44 = vadd.f32 %v344_v40, %v343_v37  ;;  %336 = vst [vmem:[%s1018_s4 + $0x60] sm:$0xff] %v581_v41  ;;  %v354_v45 = vadd.f32 %v581_v41, %v353_v36  ;;  %v584_v46 = vadd.f32 %v583_v43, %v582_v42 }
 0x113   :  { %v346_v47 = vrot.slane %v345_v44, 2  ;;  %337 = vst [vmem:[%s1018_s4 + $0x68] sm:$0xff] %v584_v46  ;;  %v355_v48 = vadd.f32 %v584_v46, %v354_v45  ;;  %s719_s4 = scalar_lea.vmem %s473_s2, 32 }
 0x114   :  { %p720_p0 = scmp.ne.s32.totalorder %s473_s2, %s719_s4  ;;  %p725_p2 = scmp.lt.s32.totalorder %s719_s4, %s719_s4 }
 0x115   :  { %v347_v49 = vadd.f32 %v346_v47, %v345_v44  ;;  %v356_v50 = vrot.slane %v355_v48, 4 }
 0x116   :  { %p726_p3 = por %p725_p2, %p724_p1 }
 0x117   :  { %v357_v51 = vadd.f32 %v356_v50, %v355_v48  ;;  %v348_v52 = vrot.slane %v347_v49, 1 }
 0x118   :  { %p727_p4 = pnand %p726_p3, %p720_p0 }
 0x119   :  { %v358_v53 = vrot.slane %v357_v51, 2  ;;  %v349_v55 = vadd.f32 %v348_v52, %v347_v49 }
 0x11b   :  { %v359_v54 = vadd.f32 %v358_v53, %v357_v51  ;;  %v362_v59 = vmul.f32 0.020408163, %v349_v55 }
 0x11d   :  { %v360_v56 = vrot.slane %v359_v54, 1 }
 0x11f   :  { %v361_v57 = vadd.f32 %v360_v56, %v359_v54 }
 0x121   :  { %v363_v58 = vmul.f32 0.020408163, %v361_v57 }
 0x123   :  { %v367_v60 = vsel %vm366_vm1, %v363_v58, %v362_v59 }
 0x124   :  { %635 = vmatmul.mubr.f32.vlgmr.msra.gmra.mrb[16].mxu1 %v367_v60  ;;  %369 = vst [vmem:[#allocation2] sm:$0x3] %v367_v60 }
 0x125   :  { %730 = shalt.err (!%p727_p4)
}
 0x126   :  { %s731_s1 = scalar_lea.hbm %s1019_s5, 32 }
 0x127   :  { %p732_p5 = scmp.ne.s32.totalorder %s1019_s5, %s731_s1  ;;  %p735_p6 = scmp.lt.u32.totalorder %s731_s1, %s1019_s5 }
 0x129   :  { %p737_p7 = pnand %p735_p6, %p732_p5 }
 0x12b   :  { %740 = shalt.err (!%p737_p7)
}
 0x12c   :  { %475 = dma.vmem_to_hbm [thread:$0]  %s473_s2, 32, %s1019_s5, [#allocation3]   ;;  %v526_v61 = vld [vmem:[%s1017_s3] ss:$0 sm:$0xff] }
 0x12d   :  { %s771_s25 = smov [#allocation4]  }
 0x12e   :  { %s482_s26 = sshll.u32 %s771_s25, 4  ;;  %s483_s26 = int_to_ptr.vmem [resolvable:$true] %s482_s26 }
 0x12f   :  { %s741_s27 = scalar_lea.vmem %s483_s26, 32  ;;  %p746_p9 = scmp.lt.s32.totalorder %s483_s26, %s483_s26 }
 0x130   :  { %p742_p8 = scmp.ne.s32.totalorder %s483_s26, %s741_s27  ;;  %p747_p10 = scmp.lt.s32.totalorder %s741_s27, %s741_s27 }
 0x132   :  { %p748_p11 = por %p747_p10, %p746_p9 }
 0x134   :  { %p749_p12 = pnand %p748_p11, %p742_p8 }
 0x1f7   :  { %v459_v62 = vpop.f32.mrb[16].mxu1 }
 0x1f8   :  { %v460_v63 = vadd.f32 %v526_v61, %v459_v62  ;;  %v636_v0 = vpop.f32.mrb[17].mxu1 }
 0x1fa   :  { %463 = vst [vmem:[#allocation4] sm:$0x3] %v460_v63 }
 0x1fb   :  { %752 = shalt.err (!%p749_p12)
}
 0x1fc   :  { %s753_s29 = scalar_lea.hbm %s1020_s6, 32 }
 0x1fd   :  { %p754_p13 = scmp.ne.s32.totalorder %s1020_s6, %s753_s29  ;;  %p757_p0 = scmp.lt.u32.totalorder %s753_s29, %s1020_s6 }
 0x1ff   :  { %p759_p1 = pnand %p757_p0, %p754_p13 }
 0x201   :  { %762 = shalt.err (!%p759_p1)
}
 0x202   :  { %485 = dma.vmem_to_hbm [thread:$0]  %s483_s26, 32, %s1020_s6, [#allocation5]  }
 0x203   :  { %763 = dma.done.wait [#allocation3], 32  }
 0x204   :  { %764 = vsyncadd [#allocation3], 4294967264 }
 0x205   :  { %765 = dma.done.wait [#allocation5], 32  }
 0x206   :  { %766 = vsyncadd [#allocation5], 4294967264 }
 0x207   :  { %494 = vsyncpa [#allocation3], 1 }
 0x208   :  { %495 = vsyncpa [#allocation5], 1 }

</bundles_post_ra>
